<compile_context>
chip_gen: v7x
topology: tpu7x:2x2x1
jax: 0.10.0
libtpu: 0.0.40
codegen_flags: <defaults>
</compile_context>

<pallas_src>
import jax
import jax.numpy as jnp
from jax import lax
from jax.experimental import pallas as pl
from jax.experimental.pallas import tpu as pltpu

NEG_SLOPE = 0.01  # torch LeakyReLU default (dead after the where; kept for docs)


def _fused_linear_relu_kernel(x_ref, w_ref, o_ref):
    # x_ref: (TB, K) input rows for this tile
    # w_ref: (N, K)  Linear weight in native torch layout (tiny, kept resident)
    # o_ref: (TB, N) output tile (minor dim N spans the full array -> contiguous
    #                HBM writeback; masked vst in VMEM only)
    v1 = lax.dot_general(
        x_ref[...], w_ref[...],
        dimension_numbers=(((1,), (1,)), ((), ())),   # contract K with K
        preferred_element_type=jnp.float32,
    )
    # where(v1>0, v1, zero_param) followed by LeakyReLU == where(v1>0, v1, 0):
    # the result is always >= 0 so the negative-slope branch is dead.
    o_ref[...] = jnp.where(v1 > 0.0, v1, 0.0)


def fused_forward(x, w, *, batch_tile=8192):
    """x: (B, K) f32; w: (N, K) f32 (torch Linear weight layout). Returns (B, N)."""
    B, K = x.shape
    N, K2 = w.shape
    assert K == K2
    assert batch_tile % 8 == 0  # sublane alignment for partial-tile grids

    cost = pl.CostEstimate(
        flops=2 * B * K * N,
        transcendentals=0,
        bytes_accessed=4 * (B * K + N * K + B * N),
    )
    # 32-wide / 3-wide minor dims pad to 128 lanes in VMEM: budget explicitly.
    cparams_common = dict(vmem_limit_bytes=32 << 20)

    if B <= batch_tile:
        # Small/medium batch: one launch, whole arrays as single VMEM blocks,
        # no grid bookkeeping, no separate transpose pass.
        return pl.pallas_call(
            _fused_linear_relu_kernel,
            out_shape=jax.ShapeDtypeStruct((B, N), jnp.float32),
            cost_estimate=cost,
            compiler_params=pltpu.CompilerParams(**cparams_common),
        )(x, w)

    # Large batch: batch-tiled grid (cdiv handles ragged B; out-of-bounds rows
    # of the last tile are dropped on writeback and never contaminate valid
    # rows since the op is row-independent).  B > batch_tile guarantees the
    # grid has >= 2 steps, so "parallel" can shard across v7x's two TCs.
    nb = pl.cdiv(B, batch_tile)
    return pl.pallas_call(
        _fused_linear_relu_kernel,
        out_shape=jax.ShapeDtypeStruct((B, N), jnp.float32),
        grid=(nb,),
        in_specs=[
            pl.BlockSpec((batch_tile, K), lambda i: (i, 0)),
            pl.BlockSpec((N, K), lambda i: (0, 0)),  # weight stays resident
        ],
        out_specs=pl.BlockSpec((batch_tile, N), lambda i: (i, 0)),
        cost_estimate=cost,
        compiler_params=pltpu.CompilerParams(
            dimension_semantics=("parallel",),
            **cparams_common,
        ),
    )(x, w)


def _reference(x, w):
    v1 = x @ w.T
    v4 = jnp.where(v1 > 0, v1, 0.0)
    return jnp.where(v4 >= 0, v4, NEG_SLOPE * v4)


if __name__ == "__main__":
    key = jax.random.PRNGKey(0)
    kx, kw, kx2, kx3 = jax.random.split(key, 4)

    IN_FEATURES, OUT_FEATURES, BATCH = 32, 3, 1

    # Matches torch.randn(1, 32)
    x = jax.random.normal(kx, (BATCH, IN_FEATURES), dtype=jnp.float32)

    # Deterministic Linear weight init (Kaiming-uniform-like bound, as torch Linear).
    bound = 1.0 / (IN_FEATURES ** 0.5)
    w = jax.random.uniform(
        kw, (OUT_FEATURES, IN_FEATURES), minval=-bound, maxval=bound,
        dtype=jnp.float32,
    )

    # Spec shape (B=1): single-block, no-grid path.
    out = fused_forward(x, w)
    jax.block_until_ready(out)
    assert out.shape == (BATCH, OUT_FEATURES)
    assert jnp.allclose(out, _reference(x, w), atol=1e-5, rtol=1e-5)

    # Medium batch still takes the single-launch path (B <= batch_tile).
    B_MED = 2048
    x_med = jax.random.normal(kx2, (B_MED, IN_FEATURES), dtype=jnp.float32)
    out_med = fused_forward(x_med, w)
    jax.block_until_ready(out_med)
    assert out_med.shape == (B_MED, OUT_FEATURES)
    assert jnp.allclose(out_med, _reference(x_med, w), atol=1e-5, rtol=1e-5)

    # Exercise the batch-tiled grid path with a ragged batch (partial last tile),
    # using a small tile so the test stays small.
    B_RAGGED = 2500
    x_rag = jax.random.normal(kx3, (B_RAGGED, IN_FEATURES), dtype=jnp.float32)
    out_rag = fused_forward(x_rag, w, batch_tile=1024)   # grid = cdiv(2500,1024) = 3
    jax.block_until_ready(out_rag)
    assert out_rag.shape == (B_RAGGED, OUT_FEATURES)
    assert jnp.allclose(out_rag, _reference(x_rag, w), atol=1e-5, rtol=1e-5)

    print("KERNEL_OK")
</pallas_src>

<mosaic_0001>
module attributes {stable_mosaic.version = 11 : i64} {
  func.func @_fused_linear_relu_kernel(%arg0: memref<1x32xf32, #tpu.memory_space<vmem>>, %arg1: memref<3x32xf32, #tpu.memory_space<vmem>>, %arg2: memref<1x3xf32, #tpu.memory_space<vmem>>) attributes {dimension_semantics = [], scalar_prefetch = 0 : i64, scratch_operands = 0 : i64, tpu.core_type = #tpu.core_type<tc>} {
    %c0 = arith.constant 0 : index
    %c0_0 = arith.constant 0 : index
    %0 = vector.load %arg0[%c0, %c0_0] : memref<1x32xf32, #tpu.memory_space<vmem>>, vector<1x32xf32>
    %c0_1 = arith.constant 0 : index
    %c0_2 = arith.constant 0 : index
    %1 = vector.load %arg1[%c0_1, %c0_2] : memref<3x32xf32, #tpu.memory_space<vmem>>, vector<3x32xf32>
    %cst = arith.constant dense<0.000000e+00> : vector<1x3xf32>
    %2 = tpu.matmul %0, %1, %cst {dimension_numbers = #tpu.dot_dimension_numbers<[1], [1], [0], [0], [0, 0, 1, 0], [], []>} : vector<1x32xf32>, vector<3x32xf32>, vector<1x3xf32> -> vector<1x3xf32>
    %cst_3 = arith.constant 0.000000e+00 : f32
    %3 = vector.broadcast %cst_3 : f32 to vector<1x3xf32>
    %4 = arith.cmpf ogt, %2, %3 : vector<1x3xf32>
    %cst_4 = arith.constant 0.000000e+00 : f32
    %5 = vector.broadcast %cst_4 : f32 to vector<1x3xf32>
    %6 = arith.select %4, %2, %5 : vector<1x3xi1>, vector<1x3xf32>
    %c0_5 = arith.constant 0 : index
    %c0_6 = arith.constant 0 : index
    %7 = vector.load %arg2[%c0_5, %c0_6] : memref<1x3xf32, #tpu.memory_space<vmem>>, vector<1x3xf32>
    tpu.vector_store %arg2[%c0_5, %c0_6], %6 {strides = array<i32>} : memref<1x3xf32, #tpu.memory_space<vmem>>, vector<1x3xf32>,
    return
  }
}

</mosaic_0001>

<bundles_post_ra>
// kernel: tpu_custom_call.1
= control target key start
LH: loop header
LB: loop body
LE: loop exit
PB: predicated region body
PF: predicated region fallthrough
CT: control target
= control target key end

     0   :  { %7 = vsyncpa [#allocation3], 0  ;;  %s277_s0 = inlined_call_operand.hbm [shape: f32[1,32], index: 0, kind: input, shape index: {}]   ;;  %s278_s1 = inlined_call_operand.hbm [shape: f32[3,32], index: 1, kind: input, shape index: {}]   ;;  %s279_s2 = inlined_call_operand.hbm [shape: f32[1,3], index: 2, kind: output, shape index: {}]  }
   0x1   :  { %8 = vsyncpa [#allocation6], 0 }
   0x2   :  { %9 = vsyncpa [#allocation4], 0  ;;  %s221_s9 = smov [#allocation2]   ;;  %s222_s11 = smov [#allocation5]  }
   0x3   :  { %s16_s10 = sshll.u32 %s221_s9, 4  ;;  %s26_s12 = sshll.u32 %s222_s11, 4  ;;  %s17_s10 = int_to_ptr.vmem [resolvable:$true] %s16_s10  ;;  %s27_s12 = int_to_ptr.vmem [resolvable:$true] %s26_s12 }
   0x4   :  { %s149_s15 = scalar_lea.hbm %s277_s0, 16 }
   0x5   :  { %p150_p0 = scmp.ne.s32.totalorder %s277_s0, %s149_s15  ;;  %p153_p1 = scmp.lt.u32.totalorder %s149_s15, %s277_s0 }
   0x7   :  { %p155_p2 = pnand %p153_p1, %p150_p0 }
   0x9   :  { %158 = shalt.err (!%p155_p2)
}
   0xa   :  { %s159_s20 = scalar_lea.vmem %s17_s10, 16  ;;  %s163_s21 = scalar_lea.vmem %s17_s10, 32 }
   0xb   :  { %p160_p3 = scmp.ne.s32.totalorder %s17_s10, %s159_s20  ;;  %p164_p4 = scmp.lt.s32.totalorder %s17_s10, %s17_s10 }
   0xc   :  { %p165_p5 = scmp.lt.s32.totalorder %s163_s21, %s159_s20 }
   0xe   :  { %p166_p6 = por %p165_p5, %p164_p4 }
  0x10   :  { %p167_p7 = pnand %p166_p6, %p160_p3 }
  0x12   :  { %170 = shalt.err (!%p167_p7)
}
  0x13   :  { %19 = dma.hbm_to_vmem [thread:$0]  %s277_s0, 16, %s17_s10, [#allocation3]  }
  0x14   :  { %s171_s26 = scalar_lea.hbm %s278_s1, 64 }
  0x15   :  { %p172_p8 = scmp.ne.s32.totalorder %s278_s1, %s171_s26  ;;  %p175_p9 = scmp.lt.u32.totalorder %s171_s26, %s278_s1 }
  0x17   :  { %p177_p10 = pnand %p175_p9, %p172_p8 }
  0x19   :  { %180 = shalt.err (!%p177_p10)
}
  0x1a   :  { %s181_s3 = scalar_lea.vmem %s27_s12, 64  ;;  %p186_p12 = scmp.lt.s32.totalorder %s27_s12, %s27_s12 }
  0x1b   :  { %p182_p11 = scmp.ne.s32.totalorder %s27_s12, %s181_s3  ;;  %p187_p13 = scmp.lt.s32.totalorder %s181_s3, %s181_s3 }
  0x1d   :  { %p188_p0 = por %p187_p13, %p186_p12 }
  0x1f   :  { %p189_p1 = pnand %p188_p0, %p182_p11 }
  0x21   :  { %192 = shalt.err (!%p189_p1)
}
  0x22   :  { %29 = dma.hbm_to_vmem [thread:$0]  %s278_s1, 64, %s27_s12, [#allocation6]  }
  0x23   :  { %215 = dma.done.wait [#allocation3], 16  }
  0x24   :  { %216 = vsyncadd [#allocation3], 4294967280 }
  0x25   :  { %217 = dma.done.wait [#allocation6], 64  }
  0x26   :  { %218 = vsyncadd [#allocation6], 4294967232  ;;  %v223_v0 = vmov 0.0   ;;  %vm224_vm0 = vmmov 0   ;;  %vm38_vm1 = vcmask 261120   ;;  %s225_s5 = smov [#allocation7]  }
  0x27   :  { %139 = vmatprep.subr.mxu0 %v223_v0  ;;  %141 = vmatprep.mubr.msk.f32.mxu0 %vm224_vm0, %v223_v0  ;;  %v37_v1 = vld [vmem:[#allocation5] sm:$0x7]  ;;  %v36_v2 = vld [vmem:[#allocation2] sm:$0x1]  ;;  %s125_s6 = sshll.u32 %s225_s5, 4  ;;  %vm117_vm2 = vcmask 16384   ;;  %s126_s6 = int_to_ptr.vmem [resolvable:$true] %s125_s6 }
  0x28   :  { %140 = vmatpush3.xpose.msk.msra.mxu0 %vm38_vm1, %v37_v1  ;;  %s193_s1 = scalar_lea.vmem %s126_s6, 16  ;;  %s197_s7 = scalar_lea.vmem %s126_s6, 32 }
  0x29   :  { %p194_p2 = scmp.ne.s32.totalorder %s126_s6, %s193_s1  ;;  %p198_p3 = scmp.lt.s32.totalorder %s126_s6, %s126_s6 }
  0x2a   :  { %p199_p4 = scmp.lt.s32.totalorder %s197_s7, %s193_s1 }
  0x2b   :  { %142 = vmatmul.mubr.msk.f32.vlgmr.msra.gmra.mrb[0].mxu0 %vm38_vm1, %v36_v2 }
  0x2c   :  { %p200_p5 = por %p199_p4, %p198_p3 }
  0x2e   :  { %p201_p6 = pnand %p200_p5, %p194_p2 }
  0xfe   :  { %v111_v3 = vpop.f32.mrb[0].mxu0 }
  0xff   :  { %vm115_vm3 = vcmp.gt.f32.partialorder %v111_v3, 0.0  ;;  %v143_v4 = vpop.f32.mrb[1].mxu0 }
 0x100   :  { %v116_v5 = vsel %vm115_vm3, %v111_v3, 0.0 }
 0x101   :  { %118 = vst.msk [vmem:[#allocation7] sm:$0x1] %vm117_vm2, %v116_v5 }
 0x102   :  { %204 = shalt.err (!%p201_p6)
}
 0x103   :  { %s205_s10 = scalar_lea.hbm %s279_s2, 16 }
 0x104   :  { %p206_p7 = scmp.ne.s32.totalorder %s279_s2, %s205_s10  ;;  %p209_p8 = scmp.lt.u32.totalorder %s205_s10, %s279_s2 }
 0x106   :  { %p211_p9 = pnand %p209_p8, %p206_p7 }
 0x108   :  { %214 = shalt.err (!%p211_p9)
}
 0x109   :  { %128 = dma.vmem_to_hbm [thread:$0]  %s126_s6, 16, %s279_s2, [#allocation4]  }
 0x10a   :  { %219 = dma.done.wait [#allocation4], 16  }
 0x10b   :  { %220 = vsyncadd [#allocation4], 4294967280 }
 0x10c   :  { %132 = vsyncpa [#allocation3], 1 }
 0x10d   :  { %133 = vsyncpa [#allocation6], 1 }
 0x10e   :  { %134 = vsyncpa [#allocation4], 1 }

</bundles_post_ra>
